<compile_context>
chip_gen: v6e
topology: v6e:2x2x1
jax: 0.10.0
libtpu: 0.0.40
codegen_flags: <defaults>
</compile_context>

<pallas_src>
import functools

import jax
import jax.numpy as jnp
from jax.experimental import pallas as pl
from jax.experimental.pallas import tpu as pltpu

_MiB = 1024 * 1024
_ITEM = 4  # float32 bytes


def _round_up(x, m):
    return ((x + m - 1) // m) * m


def _vmem_limits():
    """Generation-aware (vmem_limit_bytes, pipeline-block byte budget)."""
    try:
        phys = int(pltpu.get_tpu_info().vmem_capacity_bytes)
    except Exception:
        phys = 64 * _MiB                      # conservative (v7x-sized) default
    # Leave headroom for weights / scratch / compiler-internal scratch:
    # 112 MiB on v5e/v6e (128 MiB physical), 48 MiB on v7x (64 MiB physical).
    limit = max(32 * _MiB, phys - 16 * _MiB)
    budget = limit // 2                       # bytes for pipelined in/out blocks
    return limit, budget


def _pick_bt(B, fits):
    """Largest divisor of B that fits the budget while keeping >=4 (else >=2)
    grid steps, so DMA/compute overlap and both v7x TensorCores run."""
    divs = [d for d in range(1, B + 1) if B % d == 0 and fits(d)]
    if not divs:
        return None
    for min_steps in (4, 2):
        ok = [d for d in divs if B // d >= min_steps]
        if ok:
            return max(ok)
    return max(divs)


# ---------------------------------------------------------------------------
# Single-pass kernel: whole (bt, C, HW) block resident in VMEM.
# ---------------------------------------------------------------------------
def _fused_channel_attn_kernel(gamma_ref, x_ref, w1t_ref, w2t_ref, o_ref, *,
                               flat_out):
    x = x_ref[...]                                     # (bt, C, HW) f32
    bt, _, hw = x.shape

    # Adaptive avg / max pool to 1x1 -> per-channel (bt, C) vectors.
    avg = jnp.sum(x, axis=-1) * (1.0 / hw)
    mx = jnp.max(x, axis=-1)

    # Fused squeeze-excite: one fc1 over stacked [max; avg], then (fc2 linear,
    # bias-free) a single fc2 on the sum of the two branches -> 2 MXU matmuls.
    pooled = jnp.concatenate([mx, avg], axis=0)        # (2*bt, C)
    h = jnp.maximum(
        jnp.dot(pooled, w1t_ref[...], preferred_element_type=jnp.float32), 0.0)
    h = h[:bt] + h[bt:]                                # (bt, Cr)
    logits = jnp.dot(h, w2t_ref[...], preferred_element_type=jnp.float32)
    attn = jax.nn.sigmoid(logits)                      # (bt, C)

    gamma = gamma_ref[0]
    out = x * (1.0 + gamma * attn[:, :, None])         # broadcast over HW
    if flat_out:
        # Lane-dense store for HW % 128 != 0 stages (avoids masked vst).
        o_ref[...] = out.reshape(bt, 1, -1)
    else:
        o_ref[...] = out


# ---------------------------------------------------------------------------
# Two-pass fallback for large HW / small VMEM.
#   Pass 1: HW-tiled reduction (masked ragged tail) -> per-(b, c) attention.
#   Pass 2: purely elementwise, fully parallel gating with large tiles.
# ---------------------------------------------------------------------------
def _attn_only_kernel(x_ref, w1t_ref, w2t_ref, attn_ref, sum_acc, max_acc, *,
                      hw_total, thw, mask_tail):
    k = pl.program_id(1)

    @pl.when(k == 0)
    def _():
        sum_acc[...] = jnp.zeros_like(sum_acc)
        max_acc[...] = jnp.full_like(max_acc, -jnp.inf)

    x = x_ref[...]                                     # (bt, C, thw)
    if mask_tail:
        col = k * thw + jax.lax.broadcasted_iota(jnp.int32, x.shape, 2)
        valid = col < hw_total
        x_sum = jnp.where(valid, x, 0.0)
        x_max = jnp.where(valid, x, -jnp.inf)
    else:
        x_sum = x
        x_max = x
    sum_acc[...] += jnp.sum(x_sum, axis=-1)
    max_acc[...] = jnp.maximum(max_acc[...], jnp.max(x_max, axis=-1))

    @pl.when(k == pl.num_programs(1) - 1)
    def _():
        bt = sum_acc.shape[0]
        avg = sum_acc[...] * (1.0 / hw_total)
        pooled = jnp.concatenate([max_acc[...], avg], axis=0)     # (2*bt, C)
        h = jnp.maximum(
            jnp.dot(pooled, w1t_ref[...], preferred_element_type=jnp.float32),
            0.0)
        h = h[:bt] + h[bt:]                                       # (bt, Cr)
        logits = jnp.dot(h, w2t_ref[...], preferred_element_type=jnp.float32)
        attn_ref[...] = jax.nn.sigmoid(logits)[:, None, :]        # (bt, 1, C)


def _gate_kernel(gamma_ref, attn_ref, x_ref, o_ref):
    gamma = gamma_ref[0]
    attn = attn_ref[...][:, 0, :, None]                # (bt, C, 1)
    o_ref[...] = x_ref[...] * (1.0 + gamma * attn)


# ---------------------------------------------------------------------------
# Wrapper
# ---------------------------------------------------------------------------
def selfchannelbranch_forward(x_nchw, w_fc1, w_fc2, gamma, *,
                              donate_x=False, vmem_override_bytes=None):
    """x_nchw: (B, C, H, W) f32; w_fc1: (C//6, C); w_fc2: (C, C//6); gamma: (1,)."""
    B, C, H, W = x_nchw.shape
    HW = H * W
    Cr = w_fc1.shape[0]

    # Free reshape: NCHW is already contiguous as (B, C, H*W).
    x = x_nchw.reshape(B, C, HW)
    w1t = jnp.transpose(w_fc1)            # (C, Cr)  tiny
    w2t = jnp.transpose(w_fc2)            # (Cr, C)  tiny

    vmem_limit, block_budget = _vmem_limits()
    if vmem_override_bytes is not None:   # testing hook: force the fallback
        block_budget = vmem_override_bytes

    weights_bytes = 2 * (2 * C * Cr * _ITEM)   # both weights, double-buffered

    def single_pass_bytes(bt):
        # x in + out blocks, each double-buffered by the Pallas pipeline.
        return 4 * bt * C * HW * _ITEM + weights_bytes

    bt = _pick_bt(B, lambda d: single_pass_bytes(d) <= block_budget)

    if bt is not None:
        # --------------------------- single pass ---------------------------
        cost = pl.CostEstimate(
            flops=int(5 * B * C * HW + 6 * B * C * Cr),
            transcendentals=int(B * C),
            bytes_accessed=int(2 * B * C * HW * _ITEM + weights_bytes),
        )
        # Lane-dense output for ragged-HW stages (7x7 / 14x14 maps).
        flat_out = (HW % 128 != 0) and ((C * HW) % 128 == 0)
        if flat_out:
            out_shape = jax.ShapeDtypeStruct((B, 1, C * HW), x.dtype)
            out_spec = pl.BlockSpec((bt, 1, C * HW), lambda b: (b, 0, 0))
        else:
            out_shape = jax.ShapeDtypeStruct((B, C, HW), x.dtype)
            out_spec = pl.BlockSpec((bt, C, HW), lambda b: (b, 0, 0))

        io_aliases = {1: 0} if (donate_x and not flat_out) else {}

        out = pl.pallas_call(
            functools.partial(_fused_channel_attn_kernel, flat_out=flat_out),
            out_shape=out_shape,
            grid_spec=pl.GridSpec(
                grid=(B // bt,),
                in_specs=[
                    pl.BlockSpec(memory_space=pltpu.MemorySpace.SMEM),  # gamma
                    pl.BlockSpec((bt, C, HW), lambda b: (b, 0, 0)),     # x
                    pl.BlockSpec((C, Cr), lambda b: (0, 0)),            # w1t
                    pl.BlockSpec((Cr, C), lambda b: (0, 0)),            # w2t
                ],
                out_specs=out_spec,
            ),
            compiler_params=pltpu.CompilerParams(
                dimension_semantics=("parallel",),
                vmem_limit_bytes=int(vmem_limit)),
            cost_estimate=cost,
            input_output_aliases=io_aliases,
        )(gamma, x, w1t, w2t)
        return out.reshape(B, C, H, W)

    # ------------------------ two-pass fallback --------------------------
    # Small batch folding: keep >= 2 parallel grid steps over batch.
    bt_fb = 1
    for d in range(min(B, 8), 0, -1):
        if B % d == 0 and (B // d >= 2 or B == 1):
            bt_fb = d
            break

    hw_pad = _round_up(HW, 128)

    def pick_thw(n_bufs):
        per_col = n_bufs * bt_fb * C * _ITEM       # bytes per HW column (all buffers)
        thw = (block_budget // per_col) // 128 * 128
        thw = max(128, min(thw, hw_pad))
        if thw >= HW:
            return HW                              # full extent (always legal)
        return thw

    thw_r = pick_thw(2)                            # reduction: only x pipelined
    thw_g = pick_thw(4)                            # gate: x in + out pipelined
    kt_r = pl.cdiv(HW, thw_r)
    kt_g = pl.cdiv(HW, thw_g)

    attn_cost = pl.CostEstimate(
        flops=int(2 * B * C * HW + 6 * B * C * Cr),
        transcendentals=int(B * C),
        bytes_accessed=int(B * C * HW * _ITEM + B * C * _ITEM + weights_bytes),
    )
    attn = pl.pallas_call(
        functools.partial(_attn_only_kernel, hw_total=HW, thw=thw_r,
                          mask_tail=(HW % thw_r != 0)),
        out_shape=jax.ShapeDtypeStruct((B, 1, C), jnp.float32),
        grid_spec=pltpu.PrefetchScalarGridSpec(
            num_scalar_prefetch=0,
            grid=(B // bt_fb, kt_r),
            in_specs=[
                pl.BlockSpec((bt_fb, C, thw_r), lambda b, k: (b, 0, k)),
                pl.BlockSpec((C, Cr), lambda b, k: (0, 0)),
                pl.BlockSpec((Cr, C), lambda b, k: (0, 0)),
            ],
            out_specs=pl.BlockSpec((bt_fb, 1, C), lambda b, k: (b, 0, 0)),
            scratch_shapes=[pltpu.VMEM((bt_fb, C), jnp.float32),
                            pltpu.VMEM((bt_fb, C), jnp.float32)],
        ),
        compiler_params=pltpu.CompilerParams(
            dimension_semantics=("parallel", "arbitrary"),
            vmem_limit_bytes=int(vmem_limit)),
        cost_estimate=attn_cost,
    )(x, w1t, w2t)

    gate_cost = pl.CostEstimate(
        flops=int(3 * B * C * HW),
        transcendentals=0,
        bytes_accessed=int(2 * B * C * HW * _ITEM + B * C * _ITEM),
    )
    io_aliases = {2: 0} if donate_x else {}
    out = pl.pallas_call(
        _gate_kernel,
        out_shape=jax.ShapeDtypeStruct((B, C, HW), x.dtype),
        grid_spec=pl.GridSpec(
            grid=(B // bt_fb, kt_g),
            in_specs=[
                pl.BlockSpec(memory_space=pltpu.MemorySpace.SMEM),        # gamma
                pl.BlockSpec((bt_fb, 1, C), lambda b, k: (b, 0, 0)),      # attn
                pl.BlockSpec((bt_fb, C, thw_g), lambda b, k: (b, 0, k)),  # x
            ],
            out_specs=pl.BlockSpec((bt_fb, C, thw_g), lambda b, k: (b, 0, k)),
        ),
        compiler_params=pltpu.CompilerParams(
            dimension_semantics=("parallel", "parallel"),
            vmem_limit_bytes=int(vmem_limit)),
        cost_estimate=gate_cost,
        input_output_aliases=io_aliases,
    )(gamma, attn, x)
    return out.reshape(B, C, H, W)


def selfchannelbranch_reference(x_nchw, w_fc1, w_fc2, gamma):
    """Plain-JAX reference of the PyTorch forward."""
    avg = jnp.mean(x_nchw, axis=(2, 3))                # (B, C)
    mx = jnp.max(x_nchw, axis=(2, 3))                  # (B, C)

    def se(v):
        h = jnp.maximum(v @ w_fc1.T, 0.0)              # (B, Cr)
        return h @ w_fc2.T                             # (B, C)

    out2 = jax.nn.sigmoid(se(mx) + se(avg))[:, :, None, None]
    return x_nchw + gamma[0] * out2 * x_nchw


if __name__ == "__main__":
    # Small shapes consistent with the module: in_dim divisible by 6.
    B, C, H, W = 2, 48, 16, 16
    Cr = C // 6

    key = jax.random.PRNGKey(0)
    kx, k1, k2 = jax.random.split(key, 3)
    x = jax.random.normal(kx, (B, C, H, W), dtype=jnp.float32)
    w_fc1 = jax.random.normal(k1, (Cr, C), dtype=jnp.float32) * 0.1  # fc1, bias=False
    w_fc2 = jax.random.normal(k2, (C, Cr), dtype=jnp.float32) * 0.1  # fc2, bias=False
    # PyTorch __init__ sets gamma2 = 0; use a non-zero value so the attention
    # path is actually exercised.
    gamma = jnp.array([0.5], dtype=jnp.float32)

    ref = selfchannelbranch_reference(x, w_fc1, w_fc2, gamma)

    # Single-pass path (generation-aware VMEM budget).
    out = jax.block_until_ready(selfchannelbranch_forward(x, w_fc1, w_fc2, gamma))
    assert out.shape == (B, C, H, W)
    assert jnp.allclose(out, ref, atol=1e-4, rtol=1e-4)

    # Force the two-pass (HW-tiled) fallback and verify it as well.
    out2 = jax.block_until_ready(
        selfchannelbranch_forward(x, w_fc1, w_fc2, gamma,
                                  vmem_override_bytes=100_000))
    assert jnp.allclose(out2, ref, atol=1e-4, rtol=1e-4)

    # Ragged-HW fallback (HW not divisible by the 128-multiple tile): exercises
    # the masked-tail reduction and clipped gate writes.
    H2 = W2 = 12
    x3 = jax.random.normal(kx, (B, C, H2, W2), dtype=jnp.float32)
    ref3 = selfchannelbranch_reference(x3, w_fc1, w_fc2, gamma)
    out3 = jax.block_until_ready(
        selfchannelbranch_forward(x3, w_fc1, w_fc2, gamma,
                                  vmem_override_bytes=60_000))
    assert jnp.allclose(out3, ref3, atol=1e-4, rtol=1e-4)

    # TODO(synk): self.conv1 (7x7 conv+BN+ReLU) and self.softmax are defined in
    # __init__ but never used in forward(), so they are intentionally omitted.
    print("KERNEL_OK")
</pallas_src>

<mosaic_0001>
module attributes {stable_mosaic.version = 11 : i64} {
  func.func @_fused_channel_attn_kernel(%arg0: i32, %arg1: memref<1xf32, #tpu.memory_space<smem>>, %arg2: memref<1x48x256xf32, #tpu.memory_space<vmem>>, %arg3: memref<48x8xf32, #tpu.memory_space<vmem>>, %arg4: memref<8x48xf32, #tpu.memory_space<vmem>>, %arg5: memref<1x48x256xf32, #tpu.memory_space<vmem>>) attributes {dimension_semantics = [#tpu.dimension_semantics<parallel>], iteration_bounds = array<i64: 2>, scalar_prefetch = 0 : i64, scratch_operands = 0 : i64, tpu.core_type = #tpu.core_type<tc>, window_params = [{transform_indices = @transform_0, window_bounds = array<i64: 1>}, {transform_indices = @transform_1, window_bounds = array<i64: 1, 48, 256>}, {pipeline_mode = #tpu.pipeline_mode<synchronous>, transform_indices = @transform_2, window_bounds = array<i64: 48, 8>}, {pipeline_mode = #tpu.pipeline_mode<synchronous>, transform_indices = @transform_3, window_bounds = array<i64: 8, 48>}, {transform_indices = @transform_4, window_bounds = array<i64: 1, 48, 256>}]} {
    %c0 = arith.constant 0 : index
    %c0_0 = arith.constant 0 : index
    %c0_1 = arith.constant 0 : index
    %0 = vector.load %arg2[%c0, %c0_0, %c0_1] : memref<1x48x256xf32, #tpu.memory_space<vmem>>, vector<1x48x256xf32>
    %cst = arith.constant dense<0.000000e+00> : vector<1x48xf32>
    %1 = vector.multi_reduction <add>, %0, %cst [2] : vector<1x48x256xf32> to vector<1x48xf32>
    %cst_2 = arith.constant 3.906250e-03 : f32
    %2 = vector.broadcast %cst_2 : f32 to vector<1x48xf32>
    %3 = arith.mulf %1, %2 : vector<1x48xf32>
    %cst_3 = arith.constant dense<0xFF800000> : vector<1x48xf32>
    %4 = vector.multi_reduction <maximumf>, %0, %cst_3 [2] : vector<1x48x256xf32> to vector<1x48xf32>
    %5 = tpu.concatenate %4, %3 in 0 : vector<1x48xf32>, vector<1x48xf32> -> vector<2x48xf32>
    %c0_4 = arith.constant 0 : index
    %c0_5 = arith.constant 0 : index
    %6 = vector.load %arg3[%c0_4, %c0_5] : memref<48x8xf32, #tpu.memory_space<vmem>>, vector<48x8xf32>
    %cst_6 = arith.constant dense<0.000000e+00> : vector<2x8xf32>
    %7 = tpu.matmul %5, %6, %cst_6 {dimension_numbers = #tpu.dot_dimension_numbers<[1], [0], [0], [1], [0, 0, 1, 1], [], []>} : vector<2x48xf32>, vector<48x8xf32>, vector<2x8xf32> -> vector<2x8xf32>
    %cst_7 = arith.constant 0.000000e+00 : f32
    %8 = vector.broadcast %cst_7 : f32 to vector<2x8xf32>
    %9 = arith.maximumf %7, %8 : vector<2x8xf32>
    %10 = vector.extract_strided_slice %9 {offsets = [0, 0], sizes = [1, 8], strides = [1, 1]} : vector<2x8xf32> to vector<1x8xf32>
    %11 = vector.extract_strided_slice %9 {offsets = [1, 0], sizes = [1, 8], strides = [1, 1]} : vector<2x8xf32> to vector<1x8xf32>
    %12 = arith.addf %10, %11 : vector<1x8xf32>
    %c0_8 = arith.constant 0 : index
    %c0_9 = arith.constant 0 : index
    %13 = vector.load %arg4[%c0_8, %c0_9] : memref<8x48xf32, #tpu.memory_space<vmem>>, vector<8x48xf32>
    %cst_10 = arith.constant dense<0.000000e+00> : vector<1x48xf32>
    %14 = tpu.matmul %12, %13, %cst_10 {dimension_numbers = #tpu.dot_dimension_numbers<[1], [0], [0], [1], [0, 0, 1, 1], [], []>} : vector<1x8xf32>, vector<8x48xf32>, vector<1x48xf32> -> vector<1x48xf32>
    %15 = arith.negf %14 : vector<1x48xf32>
    %16 = math.exp %15 : vector<1x48xf32>
    %cst_11 = arith.constant 1.000000e+00 : f32
    %17 = vector.broadcast %cst_11 : f32 to vector<1x48xf32>
    %18 = arith.addf %17, %16 : vector<1x48xf32>
    %19 = arith.divf %17, %18 : vector<1x48xf32>
    %c0_12 = arith.constant 0 : index
    %20 = memref.load %arg1[%c0_12] : memref<1xf32, #tpu.memory_space<smem>>
    %21 = vector.shape_cast %19 : vector<1x48xf32> to vector<1x48x1xf32>
    %22 = vector.broadcast %20 : f32 to vector<1x48x1xf32>
    %23 = arith.mulf %22, %21 : vector<1x48x1xf32>
    %cst_13 = arith.constant 1.000000e+00 : f32
    %24 = vector.broadcast %cst_13 : f32 to vector<1x48x1xf32>
    %25 = arith.addf %24, %23 : vector<1x48x1xf32>
    %26 = vector.broadcast %25 : vector<1x48x1xf32> to vector<1x48x256xf32>
    %27 = arith.mulf %0, %26 : vector<1x48x256xf32>
    %c0_14 = arith.constant 0 : index
    %c0_15 = arith.constant 0 : index
    %c0_16 = arith.constant 0 : index
    %28 = vector.load %arg5[%c0_14, %c0_15, %c0_16] : memref<1x48x256xf32, #tpu.memory_space<vmem>>, vector<1x48x256xf32>
    tpu.vector_store %arg5[%c0_14, %c0_15, %c0_16], %27 {strides = array<i32>} : memref<1x48x256xf32, #tpu.memory_space<vmem>>, vector<1x48x256xf32>,
    return
  }
  func.func @transform_0(%arg0: i32) -> i32 {
    %c0_i32 = arith.constant 0 : i32
    %c0_i32_0 = arith.constant 0 : i32
    return %c0_i32 : i32
  }
  func.func @transform_1(%arg0: i32) -> (i32, i32, i32) {
    %c0_i32 = arith.constant 0 : i32
    %c0_i32_0 = arith.constant 0 : i32
    %c0_i32_1 = arith.constant 0 : i32
    return %arg0, %c0_i32, %c0_i32_0 : i32, i32, i32
  }
  func.func @transform_2(%arg0: i32) -> (i32, i32) {
    %c0_i32 = arith.constant 0 : i32
    %c0_i32_0 = arith.constant 0 : i32
    %c0_i32_1 = arith.constant 0 : i32
    return %c0_i32, %c0_i32_0 : i32, i32
  }
  func.func @transform_3(%arg0: i32) -> (i32, i32) {
    %c0_i32 = arith.constant 0 : i32
    %c0_i32_0 = arith.constant 0 : i32
    %c0_i32_1 = arith.constant 0 : i32
    return %c0_i32, %c0_i32_0 : i32, i32
  }
  func.func @transform_4(%arg0: i32) -> (i32, i32, i32) {
    %c0_i32 = arith.constant 0 : i32
    %c0_i32_0 = arith.constant 0 : i32
    %c0_i32_1 = arith.constant 0 : i32
    return %arg0, %c0_i32, %c0_i32_0 : i32, i32, i32
  }
}

</mosaic_0001>

<bundles_post_ra>
// kernel: tpu_custom_call.1
= control target key start
LH: loop header
LB: loop body
LE: loop exit
PB: predicated region body
PF: predicated region fallthrough
CT: control target
= control target key end

     0   :  { %s1166_s0 = inlined_call_operand.<no memory space> [shape: f32[1], index: 0, kind: input, shape index: {}]   ;;  %s1167_s1 = inlined_call_operand.hbm [shape: f32[2,48,256], index: 1, kind: input, shape index: {}]   ;;  %s1168_s2 = inlined_call_operand.vmem [shape: f32[48,8], index: 2, kind: input, shape index: {}]   ;;  %s1169_s3 = inlined_call_operand.vmem [shape: f32[8,48], index: 3, kind: input, shape index: {}]   ;;  %s1170_s4 = inlined_call_operand.hbm [shape: f32[2,48,256], index: 4, kind: output, shape index: {}]  }
   0x1   :  { %9 = sst [smem:[#allocation2]] %s1166_s0 }
   0x2   :  { %10 = vsyncpa [#allocation4], 0 }
   0x3   :  { %12 = vsyncpa [#allocation4 + $0x1], 0 }
   0x4   :  { %13 = vsyncpa [#allocation5], 0 }
   0x5   :  { %15 = vsyncpa [#allocation5 + $0x1], 0  ;;  %s905_s17 = smov 0   ;;  %s907_s18 = smov 0  }
   0x6   :  { %s909_s19 = smov 0   ;;  %s911_s20 = smov 0  }
   0x7 LB: > { %s926_s0 = sadd.s32 4294967295, %s867_s20   ;;  %s675_s21 = sadd.s32 4294967294, %s867_s20   ;;  %s867_s20 = sphi %s911_s20, %s1184_s20   ;;  %s863_s19 = sphi %s909_s19, %s1183_s19   ;;  %s859_s18 = sphi %s907_s18, %s1182_s18   ;;  %s855_s17 = sphi %s905_s17, %s1181_s17  }
   0x8   : > { %s930_s22 = sadd.s32 1, %s867_s20   ;;  %s49_s23 = sadd.s32 1, %s863_s19 }
   0x9   : > { %s46_s24 = ssub.s32 %s867_s20, %s930_s22  ;;  %p56_p0 = scmp.ne.s32.totalorder %s863_s19, %s859_s18 }
   0xa   : > { %p47_p1 = scmp.eq.s32.totalorder %s46_s24, 0  ;;  %p57_p2 = scmp.eq.s32.totalorder %s867_s20, 0 }
   0xb   : > { %p62_p3 = scmp.ne.s32.totalorder %s859_s18, %s855_s17  ;;  %p63_p4 = scmp.eq.s32.totalorder %s926_s0, 0 }
   0xc   : > { %s942_s25 = scalar_select %p47_p1, %s863_s19, %s49_s23  }
   0xd   : > { %p58_p5 = por %p57_p2, %p56_p0  ;;  %p944_p6 = por %p63_p4, %p62_p3 }
   0xe   : > { %p128_p7 = scmp.eq.s32.totalorder %s926_s0, 1  ;;  %p134_p8 = scmp.eq.s32.totalorder %s675_s21, 1 }
   0xf   : > { %s1173_s26 = scalar_select %p944_p6, 1, 0 }
  0x10   : > { %p731_p10 = scmp.lt.s32.totalorder %s867_s20, 2  ;;  %p951_p11 = por %p128_p7, %p56_p0 }
  0x11   : > { %p955_p12 = por %p134_p8, %p62_p3  ;;  %s163_s29 = sand.u32 1, %s863_s19  }
  0x12   : > { %s1174_s27 = scalar_select %p951_p11, 1, 0 }
  0x13   : > { %s1175_s28 = scalar_select %p955_p12, 1, 0 }
  0x14   : > { %s716_s30 = smul.u32 1536, %s867_s20  ;;  %p966_p13 = pnand %p731_p10, %p58_p5 }
  0x15   : > { %s715_s5 = smul.u32 96, %s163_s29  ;;  %s972_s12 = scalar_lea.sflag [#allocation4], %s163_s29 }
  0x16   : > { %s964_s8 = scalar_lea.hbm %s1167_s1, %s716_s30  ;;  %p777_p1 = pneg %p966_p13 }
  0x17   : > { %s167_s10 = scalar_lea.vmem [#allocation3], %s715_s5  ;;  %s775_s13 = scalar_lea.hbm %s964_s8, 1536 }
  0x18   : > { %s174_s11 = sshll.u32 %s167_s10, 4  ;;  %p776_p0 = scmp.ne.s32.totalorder %s964_s8, %s775_s13  ;;  %s970_s11 = int_to_ptr.vmem [resolvable:$true] %s174_s11 }
  0x19   : > { %s780_s16 = scalar_lea.hbm %s1167_s1, 3072  ;;  %p781_p4 = scmp.lt.s32.totalorder %s964_s8, %s1167_s1 }
  0x1a   : > { %p778_p2 = pnand %p777_p1, %p776_p0  ;;  %p782_p5 = scmp.lt.s32.totalorder %s780_s16, %s775_s13 }
  0x1c   : > { %p779_p3 = pneg %p778_p2  ;;  %p783_p7 = por %p782_p5, %p781_p4 }
  0x1e   : > { %p784_p8 = pnand %p783_p7, %p779_p3 }
  0x20   : > { %787 = shalt.err (!%p784_p8)
}
  0x21   : > { %s788_s24 = scalar_lea.vmem %s970_s11, 1536  ;;  %s869_s29 = smov [#allocation3]  }
  0x22   : > { %p789_p10 = scmp.ne.s32.totalorder %s970_s11, %s788_s24  ;;  %s793_s30 = sshll.u32 %s869_s29, 4  ;;  %s794_s30 = int_to_ptr.vmem [resolvable:$false] %s793_s30 }
  0x23   : > { %s795_s5 = scalar_lea.vmem %s794_s30, 3072  ;;  %p796_p2 = scmp.lt.s32.totalorder %s970_s11, %s794_s30 }
  0x24   : > { %p791_p9 = pnand %p789_p10, %p777_p1  ;;  %p797_p12 = scmp.lt.s32.totalorder %s795_s5, %s788_s24 }
  0x26   : > { %p792_p0 = pneg %p791_p9  ;;  %p798_p11 = por %p797_p12, %p796_p2 }
  0x28   : > { %p799_p6 = pnand %p798_p11, %p792_p0 }
  0x2a   : > { %802 = shalt.err (!%p799_p6)
}
  0x2b   : > { %s870_s6 = smov 256   ;;  %s871_s7 = smov 16  }
  0x2c   : > { %726 = dma.hbm_to_vmem [thread:$0]  (!%p966_p13), %s964_s8, 1536, %s970_s11, %s972_s12, %s870_s6, %s870_s6, %s871_s7  }
  0x2d   : > { %p679_p9 = scmp.ge.s32.totalorder %s867_s20, 1  ;;  %p182_p1 = scmp.lt.s32.totalorder %s867_s20, 3 }
  0x2f   : > { %p183_p3 = pnand %p679_p9, %p182_p1 }
  0x30   : > { %s996_s10 = sand.u32 (!%p183_p3), 1, %s859_s18   ;;  %p1177_p6 = scmp.ne.s32.totalorder (!%p183_p3), %s1173_s26, 0 }
  0x31   : > { %186 = sbr.rel (%p183_p3) target bundleno = 795 (0x31b), region = 36  ;;  %s189_s14 = scalar_lea.sflag (!%p183_p3), [#allocation4], %s996_s10 }
  0x32   : > { %s717_s13 = smul.u32 (!%p183_p3), 96, %s996_s10 }
  0x34   : > { %s192_s15 = scalar_lea.vmem (!%p183_p3), [#allocation3], %s717_s13 }
  0x36   : > { %846 = dma.done.wait (%p1177_p6), %s189_s14, 1536  }
  0x37   : > { %848 = vsyncadd (%p1177_p6), %s189_s14, 4294965760  ;;  %v1006_v0 = vld [vmem:[%s192_s15 + $0x20] sm:$0xff]  ;;  %v1008_v1 = vld [vmem:[%s192_s15 + $0x28] sm:$0xff]  ;;  %v872_v24 = vmov 0.0   ;;  %vm873_vm0 = vmmov 0   ;;  %v277_v31 = vlaneseq  ;;  %vm288_vm1 = vcmask 130112  }
  0x38   : > { %v1010_v2 = vld [vmem:[%s192_s15] sm:$0xff]  ;;  %v235_v3 = vadd.f32 %v1008_v1, %v1006_v0  ;;  %v1014_v4 = vld [vmem:[%s192_s15 + $0x8] sm:$0xff]  ;;  %v1016_v5 = vld [vmem:[%s192_s15 + $0x30] sm:$0xff]  ;;  %v259_v16 = vmax.f32 %v1006_v0, %v1008_v1  ;;  %695 = vmatprep.subr.mxu0 %v872_v24  ;;  %710 = vmatprep.subr.mxu1 %v872_v24  ;;  %vm295_vm2 = vcmask 195712   ;;  %vm302_vm3 = vcmask 261312   ;;  %s523_s14 = sld [smem:[#allocation2]] }
  0x39   : > { %v1018_v6 = vld [vmem:[%s192_s15 + $0x38] sm:$0xff]  ;;  %v229_v7 = vadd.f32 %v1014_v4, %v1010_v2  ;;  %v1022_v8 = vld [vmem:[%s192_s15 + $0x10] sm:$0xff]  ;;  %v253_v13 = vmax.f32 %v1010_v2, %v1014_v4  ;;  %v1034_v14 = vld [vmem:[%s192_s15 + $0x40] sm:$0xff]  ;;  %707 = vmatprep.mubr.msk.f32.mxu0 %vm873_vm0, %v872_v24  ;;  %712 = vmatprep.mubr.msk.f32.mxu1 %vm873_vm0, %v872_v24  ;;  %v278_v34 = vand.u32 127, %v277_v31  ;;  %v1072_v38 = vshrl.u32 %v277_v31, 7  ;;  %p1178_p12 = scmp.ne.s32.totalorder %s1174_s27, 0 }
  0x3a   : > { %v1024_v9 = vld [vmem:[%s192_s15 + $0x18] sm:$0xff]  ;;  %236 = vadd.xlane.f32.xlu1 %v235_v3  ;;  %v238_v10 = vadd.f32 %v1018_v6, %v1016_v5  ;;  %v1036_v15 = vld [vmem:[%s192_s15 + $0x48] sm:$0xff]  ;;  %v1042_v18 = vld [vmem:[%s192_s15 + $0x50] sm:$0xff]  ;;  %v262_v20 = vmax.f32 %v1016_v5, %v1018_v6  ;;  %vm309_vm4 = vcmask 326912   ;;  %vm316_vm5 = vcmask 392512   ;;  %s874_s16 = smov [#allocation6]  }
  0x3b   : > { %230 = vadd.xlane.f32.xlu0 %v229_v7  ;;  %v232_v11 = vadd.f32 %v1024_v9, %v1022_v8  ;;  %v256_v12 = vmax.f32 %v1022_v8, %v1024_v9  ;;  %v241_v17 = vadd.f32 %v1036_v15, %v1034_v14  ;;  %v1044_v19 = vld [vmem:[%s192_s15 + $0x58] sm:$0xff]  ;;  %v265_v23 = vmax.f32 %v1034_v14, %v1036_v15  ;;  %v362_v25 = vld [vmem:[%s1168_s2 + $0x28] sm:$0xff]  ;;  %v361_v26 = vld [vmem:[%s1168_s2 + $0x20] sm:$0xff]  ;;  %s1094_s15 = scalar_lea.vmem [#allocation6], %s717_s13  ;;  %s718_s13 = smul.u32 1536, %s926_s0 }
  0x3c   : > { %v244_v21 = vadd.f32 %v1044_v19, %v1042_v18  ;;  %v268_v22 = vmax.f32 %v1042_v18, %v1044_v19  ;;  %696 = vmatpush3.msra.mxu0 %v362_v25  ;;  %v360_v27 = vld [vmem:[%s1168_s2 + $0x18] sm:$0xff]  ;;  %v359_v28 = vld [vmem:[%s1168_s2 + $0x10] sm:$0xff]  ;;  %v358_v29 = vld [vmem:[%s1168_s2 + $0x8] sm:$0xff]  ;;  %v283_v36 = vadd.s32 4294967288, %v278_v34  ;;  %v290_v43 = vadd.s32 4294967280, %v278_v34  ;;  %s602_s26 = sshll.u32 %s1094_s15, 4  ;;  %s1119_s26 = int_to_ptr.vmem [resolvable:$true] %s602_s26 }
  0x3d   : > { %697 = vmatprep.subr.mxu0 %v872_v24  ;;  %v357_v30 = vld [vmem:[%s1168_s2] sm:$0xff]  ;;  %v281_v44 = vsub.s32 %v278_v34, %v1072_v38  ;;  %v297_v46 = vadd.s32 4294967272, %v278_v34  ;;  %v304_v48 = vadd.s32 4294967264, %v278_v34  ;;  %v311_v51 = vadd.s32 4294967256, %v278_v34  ;;  %s1117_s11 = scalar_lea.hbm %s1170_s4, %s718_s13  ;;  %s589_s0 = scalar_lea.sflag [#allocation5], %s996_s10 }
  0x3e   : > { %239 = vadd.xlane.f32.xlu1 %v238_v10  ;;  %698 = vmatpush3.msra.mxu0 %v361_v26  ;;  %v286_v40 = vsub.s32 %v283_v36, %v1072_v38  ;;  %v293_v52 = vsub.s32 %v290_v43, %v1072_v38  ;;  %vm355_vm6 = vcmask 1040384   ;;  %vm363_vm7 = vcmask 392192   ;;  %v442_v34 = vld [vmem:[%s1169_s3] sm:$0xff]  ;;  %s803_s12 = scalar_lea.vmem %s1119_s26, 1536  ;;  %s807_s21 = sshll.u32 %s874_s16, 4  ;;  %s808_s21 = int_to_ptr.vmem [resolvable:$false] %s807_s21 }
  0x3f   : > { %233 = vadd.xlane.f32.xlu0 %v232_v11  ;;  %699 = vmatprep.subr.mxu0 %v872_v24  ;;  %v300_v55 = vsub.s32 %v297_v46, %v1072_v38  ;;  %v307_v57 = vsub.s32 %v304_v48, %v1072_v38  ;;  %v314_v63 = vsub.s32 %v311_v51, %v1072_v38  ;;  %vm443_vm8 = vcmask 64512   ;;  %p804_p11 = scmp.ne.s32.totalorder %s1119_s26, %s803_s12  ;;  %s809_s23 = scalar_lea.vmem %s808_s21, 3072 }
  0x40   : > { %700 = vmatpush3.msra.mxu0 %v360_v27  ;;  %711 = vmatpush3.msra.mxu1 %v442_v34  ;;  %v526_v46 = vsub.s32 0, %v1072_v38  ;;  %p810_p5 = scmp.lt.s32.totalorder %s1119_s26, %s808_s21  ;;  %p811_p7 = scmp.lt.s32.totalorder %s809_s23, %s803_s12 }
  0x41   : > { %701 = vmatprep.subr.mxu0 %v872_v24  ;;  %p805_p13 = pnand %p804_p11, %p1178_p12 }
  0x42   : > { %257 = vmax.xlane.f32.xlu1 %v256_v12  ;;  %702 = vmatpush3.msra.mxu0 %v359_v28  ;;  %p812_p8 = por %p811_p7, %p810_p5 }
  0x43   : > { %254 = vmax.xlane.f32.xlu0 %v253_v13  ;;  %703 = vmatprep.subr.mxu0 %v872_v24  ;;  %p806_p4 = pneg %p805_p13 }
  0x44   : > { %704 = vmatpush3.msra.mxu0 %v358_v29 }
  0x45   : > { %705 = vmatprep.subr.mxu0 %v872_v24  ;;  %p813_p10 = pnand %p812_p8, %p806_p4 }
  0x46   : > { %260 = vmax.xlane.f32.xlu1 %v259_v16  ;;  %706 = vmatpush3.msra.mxu0 %v357_v30 }
  0x47   : > { %242 = vadd.xlane.f32.xlu0 %v241_v17 }
  0x4a   : > { %263 = vmax.xlane.f32.xlu1 %v262_v20 }
  0x4b   : > { %245 = vadd.xlane.f32.xlu0 %v244_v21 }
  0x4e   : > { %269 = vmax.xlane.f32.xlu1 %v268_v22 }
  0x4f   : > { %266 = vmax.xlane.f32.xlu0 %v265_v23 }
  0xc3   : > { %v237_v32 = vpop.xlane.xlu1 %236 }
  0xc4   : > { %v231_v33 = vpop.xlane.xlu0 %230  ;;  %v249_v53 = vmul.f32 0.00390625, %v237_v32 }
  0xc5   : > { %v247_v45 = vmul.f32 0.00390625, %v231_v33 }
  0xc6   : > { %v337_v7 = vrot.slane %v249_v53, %v293_v52 }
  0xc7   : > { %v240_v35 = vpop.xlane.xlu1 %239  ;;  %v328_v54 = vrot.slane %v247_v45, %v281_v44 }
  0xc8   : > { %v234_v37 = vpop.xlane.xlu0 %233  ;;  %v250_v56 = vmul.f32 0.00390625, %v240_v35 }
  0xc9   : > { %v248_v41 = vmul.f32 0.00390625, %v234_v37 }
  0xca   : > { %v342_v12 = vrot.slane %v250_v56, %v300_v55 }
  0xcb   : > { %v258_v39 = vpop.xlane.xlu1 %257  ;;  %v332_v49 = vrot.slane %v248_v41, %v286_v40 }
  0xcc   : > { %v255_v42 = vpop.xlane.xlu0 %254  ;;  %v287_v61 = vrot.slane %v258_v39, %v286_v40 }
  0xcd   : > { %v333_v60 = vsel %vm288_vm1, %v332_v49, %v328_v54  ;;  %v282_v62 = vrot.slane %v255_v42, %v281_v44  ;;  %v551_v49 = vstv %s523_s14 }
  0xce   : > { %v338_v16 = vsel %vm295_vm2, %v337_v7, %v333_v60 }
  0xcf   : > { %v261_v47 = vpop.xlane.xlu1 %260  ;;  %v289_v21 = vsel %vm288_vm1, %v287_v61, %v282_v62  ;;  %v343_v27 = vsel %vm302_vm3, %v342_v12, %v338_v16 }
  0xd0   : > { %v243_v50 = vpop.xlane.xlu0 %242  ;;  %v294_v10 = vrot.slane %v261_v47, %v293_v52 }
  0xd1   : > { %v251_v58 = vmul.f32 0.00390625, %v243_v50 }
  0xd2   : > { %v296_v25 = vsel %vm295_vm2, %v294_v10, %v289_v21 }
  0xd3   : > { %v264_v59 = vpop.xlane.xlu1 %263  ;;  %v347_v17 = vrot.slane %v251_v58, %v307_v57 }
  0xd4   : > { %v246_v3 = vpop.xlane.xlu0 %245  ;;  %v301_v13 = vrot.slane %v264_v59, %v300_v55 }
  0xd5   : > { %v252_v11 = vmul.f32 0.00390625, %v246_v3  ;;  %v348_v29 = vsel %vm309_vm4, %v347_v17, %v343_v27 }
  0xd6   : > { %v303_v28 = vsel %vm302_vm3, %v301_v13, %v296_v25 }
  0xd7   : > { %v270_v20 = vpop.xlane.xlu1 %269  ;;  %v352_v22 = vrot.slane %v252_v11, %v314_v63 }
  0xd8   : > { %v267_v23 = vpop.xlane.xlu0 %266  ;;  %v315_v24 = vrot.slane %v270_v20, %v314_v63 }
  0xd9   : > { %v308_v26 = vrot.slane %v267_v23, %v307_v57  ;;  %v353_v32 = vsel %vm316_vm5, %v352_v22, %v348_v29 }
  0xdb   : > { %v310_v30 = vsel %vm309_vm4, %v308_v26, %v303_v28 }
  0xdc   : > { %v317_v31 = vsel %vm316_vm5, %v315_v24, %v310_v30 }
  0xdd   : > { %v356_v33 = vsel %vm355_vm6, %v317_v31, %v353_v32 }
  0xde   : > { %708 = vmatmul.mubr.msk.f32.vlgmr.msra.gmra.mxu0 %vm363_vm7, %v356_v33 }
 0x19e   : > { %v433_v35 = vpop.f32.mrf.mxu0 }
 0x19f   : > { %v437_v36 = vmax.f32 %v433_v35, 0.0 }
 0x1a0   : > { %v709_v37 = vpop.f32.mrf.mxu0 }
 0x1a1   : > { %v439_v39 = vrot.slane %v437_v36, 1 }
 0x1a3   : > { %v441_v40 = vadd.f32 %v439_v39, %v437_v36 }
 0x1a5   : > { %713 = vmatmul.mubr.msk.f32.vlgmr.msra.gmra.mxu1 %vm443_vm8, %v441_v40 }
 0x265   : > { %v513_v41 = vpop.f32.mrf.mxu1 }
 0x266   : > { %v682_v42 = vmul.f32 -1.442695, %v513_v41 }
 0x267   : > { %v714_v43 = vpop.f32.mrf.mxu1 }
 0x268   : > { %771 = vpow2.f32 %v682_v42 }
 0x275   : > { %v772_v44 = vpop.eup %771 }
 0x276   : > { %v520_v45 = vadd.f32 1.0, %v772_v44 }
 0x278   : > { %773 = vrcp.f32 %v520_v45 }
 0x285   : > { %v774_v47 = vpop.eup %773 }
 0x286   : > { %v527_v48 = vrot.slane %v774_v47, %v526_v46 }
 0x288   : > { %533 = vbcast.lane.b32.xlu1 %v527_v48, 264  ;;  %529 = vbcast.lane.b32.xlu0 %v527_v48, 256 }
 0x28c   : > { %537 = vbcast.lane.b32.xlu1 %v527_v48, 272  ;;  %545 = vbcast.lane.b32.xlu0 %v527_v48, 288 }
 0x290   : > { %541 = vbcast.lane.b32.xlu1 %v527_v48, 280 }
 0x294   : > { %549 = vbcast.lane.b32.xlu1 %v527_v48, 296 }
 0x2fa   : > { %v534_v50 = vpop.permute.xlu1 %533  ;;  %v530_v51 = vpop.permute.xlu0 %529 }
 0x2fb   : > { %v553_v52 = vmul.f32 %v551_v49, %v534_v50  ;;  %v552_v53 = vmul.f32 %v551_v49, %v530_v51 }
 0x2fd   : > { %v559_v54 = vadd.f32 1.0, %v553_v52  ;;  %v558_v55 = vadd.f32 1.0, %v552_v53 }
 0x2fe   : > { %v538_v56 = vpop.permute.xlu1 %537  ;;  %v546_v57 = vpop.permute.xlu0 %545 }
 0x2ff   : > { %v566_v38 = vmul.f32 %v559_v54, %v1022_v8  ;;  %v567_v58 = vmul.f32 %v559_v54, %v1024_v9  ;;  %v564_v59 = vmul.f32 %v558_v55, %v1010_v2  ;;  %v565_v60 = vmul.f32 %v558_v55, %v1014_v4 }
 0x300   : > { %v554_v61 = vmul.f32 %v551_v49, %v538_v56  ;;  %v556_v62 = vmul.f32 %v551_v49, %v546_v57 }
 0x301   : > { %578 = vst [vmem:[%s1094_s15 + $0x10] sm:$0xff] %v566_v38  ;;  %579 = vst [vmem:[%s1094_s15 + $0x18] sm:$0xff] %v567_v58 }
 0x302   : > { %576 = vst [vmem:[%s1094_s15] sm:$0xff] %v564_v59  ;;  %577 = vst [vmem:[%s1094_s15 + $0x8] sm:$0xff] %v565_v60  ;;  %v560_v2 = vadd.f32 1.0, %v554_v61  ;;  %v562_v4 = vadd.f32 1.0, %v556_v62  ;;  %v542_v8 = vpop.permute.xlu1 %541 }
 0x303   : > { %v555_v9 = vmul.f32 %v551_v49, %v542_v8 }
 0x304   : > { %v568_v63 = vmul.f32 %v560_v2, %v1006_v0  ;;  %v569_v3 = vmul.f32 %v560_v2, %v1008_v1  ;;  %v572_v7 = vmul.f32 %v562_v4, %v1034_v14  ;;  %v573_v10 = vmul.f32 %v562_v4, %v1036_v15 }
 0x305   : > { %v561_v11 = vadd.f32 1.0, %v555_v9 }
 0x306   : > { %580 = vst [vmem:[%s1094_s15 + $0x20] sm:$0xff] %v568_v63  ;;  %581 = vst [vmem:[%s1094_s15 + $0x28] sm:$0xff] %v569_v3  ;;  %v550_v12 = vpop.permute.xlu1 %549 }
 0x307   : > { %584 = vst [vmem:[%s1094_s15 + $0x40] sm:$0xff] %v572_v7  ;;  %585 = vst [vmem:[%s1094_s15 + $0x48] sm:$0xff] %v573_v10  ;;  %v570_v13 = vmul.f32 %v561_v11, %v1016_v5  ;;  %v571_v0 = vmul.f32 %v561_v11, %v1018_v6  ;;  %v557_v1 = vmul.f32 %v551_v49, %v550_v12 }
 0x309   : > { %582 = vst [vmem:[%s1094_s15 + $0x30] sm:$0xff] %v570_v13  ;;  %583 = vst [vmem:[%s1094_s15 + $0x38] sm:$0xff] %v571_v0  ;;  %v563_v14 = vadd.f32 1.0, %v557_v1 }
 0x30b   : > { %v574_v5 = vmul.f32 %v563_v14, %v1042_v18  ;;  %v575_v15 = vmul.f32 %v563_v14, %v1044_v19 }
 0x30d   : > { %586 = vst [vmem:[%s1094_s15 + $0x50] sm:$0xff] %v574_v5  ;;  %587 = vst [vmem:[%s1094_s15 + $0x58] sm:$0xff] %v575_v15 }
 0x30e   : > { %816 = shalt.err (!%p813_p10)
}
 0x30f   : > { %s817_s24 = scalar_lea.hbm %s1117_s11, 1536  ;;  %s821_s5 = scalar_lea.hbm %s1170_s4, 3072 }
 0x310   : > { %p818_p0 = scmp.ne.s32.totalorder %s1117_s11, %s817_s24  ;;  %p822_p1 = scmp.lt.s32.totalorder %s1117_s11, %s1170_s4 }
 0x311   : > { %p823_p3 = scmp.lt.s32.totalorder %s821_s5, %s817_s24 }
 0x312   : > { %p819_p2 = pnand %p818_p0, %p1178_p12 }
 0x313   : > { %p824_p6 = por %p823_p3, %p822_p1 }
 0x314   : > { %p820_p9 = pneg %p819_p2 }
 0x316   : > { %p825_p11 = pnand %p824_p6, %p820_p9 }
 0x318   : > { %828 = shalt.err (!%p825_p11)
}
 0x319   : > { %s875_s14 = smov 256   ;;  %s876_s15 = smov 16  }
 0x31a   : > { %721 = dma.vmem_to_hbm [thread:$0]  (%p1178_p12), %s1119_s26, 1536, %s1117_s11, %s589_s0, %s875_s14, %s875_s14, %s876_s15  }
 0x31b PF: > { %s617_s13 = sand.u32 1, %s855_s17   ;;  %p1179_p13 = scmp.ne.s32.totalorder %s1175_s28, 0 }
 0x31c   : > { %p1180_p4 = scmp.ge.s32.totalorder %s867_s20, 2  ;;  %s618_s8 = scalar_lea.sflag [#allocation5], %s617_s13 }
 0x31e   : > { %p728_p5 = pnand %p1180_p4, %p1179_p13 }
 0x320   : > { %p729_p7 = pneg %p728_p5 }
 0x322   : > { %850 = dma.done.wait (%p729_p7), %s618_s8, 1536  }
 0x323   : > { %852 = vsyncadd (%p729_p7), %s618_s8, 4294965760  ;;  %p18_p8 = scmp.ge.s32.totalorder %s930_s22, 4   ;;  %s1181_s17 = smov %s859_s18 }
 0x324   : > { %s1182_s18 = smov %s863_s19  ;;  %s1183_s19 = smov %s942_s25 }
 0x325   : > { %s1184_s20 = smov %s930_s22  ;;  %20 = sbr.rel (!%p18_p8) target bundleno = 7 (0x7), region = 81 }
 0x32a   :  { %623 = vsyncpa [#allocation4], 1 }
 0x32b   :  { %625 = vsyncpa [#allocation4 + $0x1], 1 }
 0x32c   :  { %626 = vsyncpa [#allocation5], 1 }
 0x32d   :  { %628 = vsyncpa [#allocation5 + $0x1], 1 }

</bundles_post_ra>
